<compile_context>
chip_gen: v6e
topology: v6e:2x2x1
jax: 0.10.0
libtpu: 0.0.40
codegen_flags: <defaults>
</compile_context>

<pallas_src>
import functools

import jax
import jax.numpy as jnp
import numpy as np
from jax import lax
from jax.experimental import pallas as pl
from jax.experimental.pallas import tpu as pltpu


def _round_up(v, m):
    return (v + m - 1) // m * m


# --------------------------------------------------------------------------- kernel
def geml_kernel(x_ref,        # (T*N, D)   stacked spatial embeddings (pre-sigmoid), f32
                w_ih_ref,     # (D, 4*GS)  fused LSTM input->gate weights [i|f|g|o], bf16
                w_hh_ref,     # (H, 4*GS)  fused LSTM hidden->gate weights [i|f|g|o], bf16
                b_ref,        # (1, 4*GS)  fused gate bias (b_ih + b_hh), f32
                bn_w_ref,     # (1, D)     BatchNorm1d gamma
                bn_b_ref,     # (1, D)     BatchNorm1d beta
                w_head_ref,   # (D, D+1)   [tran_g_l^T | tran_d_l^T], bf16
                b_head_ref,   # (1, D+1)   [tran_g_l bias | tran_d_l bias], f32
                res_d_ref,    # (N, 1)     output: demand head
                res_g_ref,    # (N, N)     output: pairwise head
                *, T, N):
    D = x_ref.shape[-1]
    H = w_hh_ref.shape[0]
    GS = w_hh_ref.shape[-1] // 4            # lane stride of one gate block (>= H)

    # sigmoid of every record once (f32 on VPU/EUP)
    s_all = jax.nn.sigmoid(x_ref[...])                                   # (T*N, D)

    # Hoisted input->gate pre-activations for ALL timesteps in one MXU pass
    # (bias folded in here so the loop body is just h @ W_hh plus a row gather).
    gates_x = jnp.dot(s_all.astype(jnp.bfloat16), w_ih_ref[...],
                      preferred_element_type=jnp.float32) + b_ref[...]   # (T*N, 4*GS)

    w_hh = w_hh_ref[...]                    # (H, 4*GS) bf16 — only weight live in the loop

    mean_s = jnp.zeros((N, D), jnp.float32)
    h = jnp.zeros((N, H), jnp.float32)
    c = jnp.zeros((N, H), jnp.float32)

    # T is small & static: fully unrolled loop keeps h/c in vregs (no VMEM store/load
    # per timestep) and gives the scheduler full visibility of the serial chain.
    for t in range(T):
        lo, hi = t * N, (t + 1) * N
        mean_s = mean_s + s_all[lo:hi, :]
        gates = gates_x[lo:hi, :] + jnp.dot(
            h.astype(jnp.bfloat16), w_hh, preferred_element_type=jnp.float32)  # (N, 4*GS)
        i_g = jax.nn.sigmoid(gates[:, 0 * GS:0 * GS + H])
        f_g = jax.nn.sigmoid(gates[:, 1 * GS:1 * GS + H])
        g_g = jnp.tanh(gates[:, 2 * GS:2 * GS + H])
        o_g = jax.nn.sigmoid(gates[:, 3 * GS:3 * GS + H])
        c = f_g * c + i_g * g_g
        h = o_g * jnp.tanh(c)
    mean_s = mean_s * (1.0 / T)

    # residual add + BatchNorm1d (training-mode batch stats over the N nodes)
    temp = h + mean_s                                                    # (N, D), H == D
    mu = jnp.mean(temp, axis=0, keepdims=True)
    var = jnp.mean((temp - mu) ** 2, axis=0, keepdims=True)
    temp = (temp - mu) * lax.rsqrt(var + 1e-5) * bn_w_ref[...] + bn_b_ref[...]

    # Fused heads: [g_proj | res_d] = temp @ [Wg^T | wd^T] + [bg | bd]
    temp_bf = temp.astype(jnp.bfloat16)
    proj = jnp.dot(temp_bf, w_head_ref[...],
                   preferred_element_type=jnp.float32) + b_head_ref[...]  # (N, D+1)
    res_d_ref[...] = proj[:, D:D + 1]                                     # (N, 1)

    # res_G[i, j] = (Wg temp_i + bg) . temp_j — materialize temp^T once (f32 transpose,
    # then bf16 cast) instead of relying on an implicit transposed dot.
    g_proj_bf = proj[:, :D].astype(jnp.bfloat16)
    temp_t_bf = temp.T.astype(jnp.bfloat16)                               # (D, N)
    res_g_ref[...] = jnp.dot(g_proj_bf, temp_t_bf,
                             preferred_element_type=jnp.float32)          # (N, N)


# --------------------------------------------------------------------------- wrapper
@jax.jit
def geml_forward(x, w_ih, w_hh, b, bn_w, bn_b, wd, bd, wg_t, bg):
    T, N, D = x.shape
    H = w_hh.shape[-1]
    # The module always has temp_embed_dim == spat_embed_dim; the residual add relies on it.
    assert H == D, "GEML kernel assumes temp_embed_dim == spat_embed_dim"
    GS = _round_up(H, 64)      # per-gate lane stride: gate slices start at lane 0 or 64

    def fuse_gates(w4):        # (4, In, H) -> (In, 4*GS), zero-padded per gate block
        fused = jnp.zeros((w4.shape[1], 4 * GS), w4.dtype)
        for g in range(4):
            fused = fused.at[:, g * GS:g * GS + H].set(w4[g])
        return fused

    # ---- layout plumbing (wrapper-side, not kernel compute) ----------------------
    w_ih_f = fuse_gates(w_ih).astype(jnp.bfloat16)                        # (D, 4*GS)
    w_hh_f = fuse_gates(w_hh).astype(jnp.bfloat16)                        # (H, 4*GS)
    b_f = fuse_gates(b)                                                   # (1, 4*GS) f32
    w_head = jnp.concatenate([wg_t, wd.T], axis=1).astype(jnp.bfloat16)   # (D, D+1)
    b_head = jnp.concatenate([bg, bd], axis=1)                            # (1, D+1) f32

    vmem = pl.BlockSpec(memory_space=pltpu.MemorySpace.VMEM)
    kernel = functools.partial(geml_kernel, T=T, N=N)
    # NOTE(scaling): at realistic GEML sizes (N in the hundreds, long T) this should get a
    # grid over T (x pipelined via BlockSpec, LSTM state in scratch, axis "arbitrary"), a
    # "parallel" grid axis over N (2 TCs on v7x), lane-dense outputs and an explicit
    # vmem_limit_bytes. At the tiny test sizes a single un-gridded invocation is fastest.
    res_d, res_g = pl.pallas_call(
        kernel,
        out_shape=(jax.ShapeDtypeStruct((N, 1), jnp.float32),
                   jax.ShapeDtypeStruct((N, N), jnp.float32)),
        in_specs=[vmem] * 8,
        out_specs=(vmem, vmem),
    )(x.reshape(T * N, D), w_ih_f, w_hh_f, b_f, bn_w, bn_b, w_head, b_head)
    # match PyTorch output shapes: res_D (1, N), res_G (1, N, N)  (LSTM h has 1 layer)
    return res_d.reshape(1, N), res_g.reshape(1, N, N)


# --------------------------------------------------------------------------- reference
def geml_ref(x, w_ih, w_hh, b, bn_w, bn_b, wd, bd, wg_t, bg):
    """Pure-JAX reference, numerically matched to the kernel: bf16 MXU operands,
    f32 accumulation, f32 elementwise/transcendental math."""
    T, N, D = x.shape

    def dot32(a, w):
        return jnp.dot(a.astype(jnp.bfloat16), w.astype(jnp.bfloat16),
                       preferred_element_type=jnp.float32)

    s = jax.nn.sigmoid(x)
    mean_s = jnp.mean(s, axis=0)

    def step(carry, s_t):
        h, c = carry
        i = jax.nn.sigmoid(dot32(s_t, w_ih[0]) + dot32(h, w_hh[0]) + b[0])
        f = jax.nn.sigmoid(dot32(s_t, w_ih[1]) + dot32(h, w_hh[1]) + b[1])
        g = jnp.tanh(dot32(s_t, w_ih[2]) + dot32(h, w_hh[2]) + b[2])
        o = jax.nn.sigmoid(dot32(s_t, w_ih[3]) + dot32(h, w_hh[3]) + b[3])
        c = f * c + i * g
        h = o * jnp.tanh(c)
        return (h, c), None

    (h, _), _ = lax.scan(step, (jnp.zeros((N, D), jnp.float32),
                                jnp.zeros((N, D), jnp.float32)), s)
    temp = h + mean_s
    mu = jnp.mean(temp, axis=0, keepdims=True)
    var = jnp.mean((temp - mu) ** 2, axis=0, keepdims=True)
    temp = (temp - mu) * lax.rsqrt(var + 1e-5) * bn_w + bn_b
    res_d = (dot32(temp, wd.T) + bd).reshape(1, N)
    g_proj = dot32(temp, wg_t) + bg
    res_g = dot32(g_proj, temp.T).reshape(1, N, N)
    return res_d, res_g


# --------------------------------------------------------------------------- params
def init_params(key, hidden_dim=16):
    num_dim = 2
    D = (num_dim + 1) * hidden_dim      # spat_embed_dim == temp_embed_dim == tran_embed_dim
    H = D
    ks = jax.random.split(key, 8)
    k = 1.0 / float(np.sqrt(H))

    w_ih = jax.random.uniform(ks[0], (4, D, H), jnp.float32, -k, k)   # per-gate, x @ W layout
    w_hh = jax.random.uniform(ks[1], (4, H, H), jnp.float32, -k, k)
    b_ih = jax.random.uniform(ks[2], (4, 1, H), jnp.float32, -k, k)
    b_hh = jax.random.uniform(ks[3], (4, 1, H), jnp.float32, -k, k)
    b = b_ih + b_hh

    bn_w = jnp.ones((1, D), jnp.float32)
    bn_b = jnp.zeros((1, D), jnp.float32)

    # xavier_normal_ with linear gain (= 1.0)
    std_d = float(np.sqrt(2.0 / (D + 1)))
    wd = std_d * jax.random.normal(ks[4], (1, D), jnp.float32)
    kd = 1.0 / float(np.sqrt(D))
    bd = jax.random.uniform(ks[5], (1, 1), jnp.float32, -kd, kd)

    std_g = float(np.sqrt(2.0 / (D + D)))
    wg = std_g * jax.random.normal(ks[6], (D, D), jnp.float32)   # PyTorch (out, in)
    wg_t = wg.T                                                  # kernel/ref use x @ W^T
    bg = jax.random.uniform(ks[7], (1, D), jnp.float32, -kd, kd)

    return w_ih, w_hh, b, bn_w, bn_b, wd, bd, wg_t, bg


# --------------------------------------------------------------------------- main
if __name__ == "__main__":
    hidden_dim = 16
    D = 3 * hidden_dim        # 48
    T = 4                     # num_records
    N = 8                     # num_nodes

    key = jax.random.PRNGKey(0)
    k_x, k_p = jax.random.split(key)
    x = jax.random.normal(k_x, (T, N, D), jnp.float32)   # stacked SpatAttLayer outputs (pre-sigmoid)
    params = init_params(k_p, hidden_dim)

    res_d, res_g = geml_forward(x, *params)
    jax.block_until_ready((res_d, res_g))

    ref_d, ref_g = geml_ref(x, *params)
    np.testing.assert_allclose(np.asarray(res_d), np.asarray(ref_d), rtol=2e-2, atol=2e-2)
    np.testing.assert_allclose(np.asarray(res_g), np.asarray(ref_g), rtol=2e-2, atol=2e-2)

    assert res_d.shape == (1, N) and res_g.shape == (1, N, N)
    print("KERNEL_OK")
</pallas_src>

<mosaic_0001>
module attributes {stable_mosaic.version = 11 : i64} {
  func.func @geml_kernel(%arg0: memref<32x48xf32, #tpu.memory_space<vmem>>, %arg1: memref<48x256xbf16, #tpu.memory_space<vmem>>, %arg2: memref<48x256xbf16, #tpu.memory_space<vmem>>, %arg3: memref<1x256xf32, #tpu.memory_space<vmem>>, %arg4: memref<1x48xf32, #tpu.memory_space<vmem>>, %arg5: memref<1x48xf32, #tpu.memory_space<vmem>>, %arg6: memref<48x49xbf16, #tpu.memory_space<vmem>>, %arg7: memref<1x49xf32, #tpu.memory_space<vmem>>, %arg8: memref<8x1xf32, #tpu.memory_space<vmem>>, %arg9: memref<8x8xf32, #tpu.memory_space<vmem>>) attributes {dimension_semantics = [], scalar_prefetch = 0 : i64, scratch_operands = 0 : i64, tpu.core_type = #tpu.core_type<tc>} {
    %c0 = arith.constant 0 : index
    %c0_0 = arith.constant 0 : index
    %0 = vector.load %arg0[%c0, %c0_0] : memref<32x48xf32, #tpu.memory_space<vmem>>, vector<32x48xf32>
    %1 = arith.negf %0 : vector<32x48xf32>
    %2 = math.exp %1 : vector<32x48xf32>
    %cst = arith.constant 1.000000e+00 : f32
    %3 = vector.broadcast %cst : f32 to vector<32x48xf32>
    %4 = arith.addf %3, %2 : vector<32x48xf32>
    %5 = arith.divf %3, %4 : vector<32x48xf32>
    %6 = arith.truncf %5 : vector<32x48xf32> to vector<32x48xbf16>
    %c0_1 = arith.constant 0 : index
    %c0_2 = arith.constant 0 : index
    %7 = vector.load %arg1[%c0_1, %c0_2] : memref<48x256xbf16, #tpu.memory_space<vmem>>, vector<48x256xbf16>
    %cst_3 = arith.constant dense<0.000000e+00> : vector<32x256xf32>
    %8 = tpu.matmul %6, %7, %cst_3 {dimension_numbers = #tpu.dot_dimension_numbers<[1], [0], [0], [1], [0, 0, 1, 1], [], []>} : vector<32x48xbf16>, vector<48x256xbf16>, vector<32x256xf32> -> vector<32x256xf32>
    %c0_4 = arith.constant 0 : index
    %c0_5 = arith.constant 0 : index
    %9 = vector.load %arg3[%c0_4, %c0_5] : memref<1x256xf32, #tpu.memory_space<vmem>>, vector<1x256xf32>
    %10 = vector.broadcast %9 : vector<1x256xf32> to vector<32x256xf32>
    %11 = arith.addf %8, %10 : vector<32x256xf32>
    %c0_6 = arith.constant 0 : index
    %c0_7 = arith.constant 0 : index
    %12 = vector.load %arg2[%c0_6, %c0_7] : memref<48x256xbf16, #tpu.memory_space<vmem>>, vector<48x256xbf16>
    %cst_8 = arith.constant 0.000000e+00 : f32
    %13 = vector.broadcast %cst_8 : f32 to vector<8x48xf32>
    %cst_9 = arith.constant 0.000000e+00 : f32
    %14 = vector.broadcast %cst_9 : f32 to vector<8x48xf32>
    %cst_10 = arith.constant 0.000000e+00 : f32
    %15 = vector.broadcast %cst_10 : f32 to vector<8x48xf32>
    %16 = vector.extract_strided_slice %5 {offsets = [0, 0], sizes = [8, 48], strides = [1, 1]} : vector<32x48xf32> to vector<8x48xf32>
    %17 = arith.addf %13, %16 : vector<8x48xf32>
    %18 = vector.extract_strided_slice %11 {offsets = [0, 0], sizes = [8, 256], strides = [1, 1]} : vector<32x256xf32> to vector<8x256xf32>
    %19 = arith.truncf %14 : vector<8x48xf32> to vector<8x48xbf16>
    %cst_11 = arith.constant dense<0.000000e+00> : vector<8x256xf32>
    %20 = tpu.matmul %19, %12, %cst_11 {dimension_numbers = #tpu.dot_dimension_numbers<[1], [0], [0], [1], [0, 0, 1, 1], [], []>} : vector<8x48xbf16>, vector<48x256xbf16>, vector<8x256xf32> -> vector<8x256xf32>
    %21 = arith.addf %18, %20 : vector<8x256xf32>
    %22 = vector.extract_strided_slice %21 {offsets = [0, 0], sizes = [8, 48], strides = [1, 1]} : vector<8x256xf32> to vector<8x48xf32>
    %23 = arith.negf %22 : vector<8x48xf32>
    %24 = math.exp %23 : vector<8x48xf32>
    %cst_12 = arith.constant 1.000000e+00 : f32
    %25 = vector.broadcast %cst_12 : f32 to vector<8x48xf32>
    %26 = arith.addf %25, %24 : vector<8x48xf32>
    %27 = arith.divf %25, %26 : vector<8x48xf32>
    %28 = vector.extract_strided_slice %21 {offsets = [0, 64], sizes = [8, 48], strides = [1, 1]} : vector<8x256xf32> to vector<8x48xf32>
    %29 = arith.negf %28 : vector<8x48xf32>
    %30 = math.exp %29 : vector<8x48xf32>
    %cst_13 = arith.constant 1.000000e+00 : f32
    %31 = vector.broadcast %cst_13 : f32 to vector<8x48xf32>
    %32 = arith.addf %31, %30 : vector<8x48xf32>
    %33 = arith.divf %31, %32 : vector<8x48xf32>
    %34 = vector.extract_strided_slice %21 {offsets = [0, 128], sizes = [8, 48], strides = [1, 1]} : vector<8x256xf32> to vector<8x48xf32>
    %35 = math.tanh %34 : vector<8x48xf32>
    %36 = vector.extract_strided_slice %21 {offsets = [0, 192], sizes = [8, 48], strides = [1, 1]} : vector<8x256xf32> to vector<8x48xf32>
    %37 = arith.negf %36 : vector<8x48xf32>
    %38 = math.exp %37 : vector<8x48xf32>
    %cst_14 = arith.constant 1.000000e+00 : f32
    %39 = vector.broadcast %cst_14 : f32 to vector<8x48xf32>
    %40 = arith.addf %39, %38 : vector<8x48xf32>
    %41 = arith.divf %39, %40 : vector<8x48xf32>
    %42 = arith.mulf %33, %15 : vector<8x48xf32>
    %43 = arith.mulf %27, %35 : vector<8x48xf32>
    %44 = arith.addf %42, %43 : vector<8x48xf32>
    %45 = math.tanh %44 : vector<8x48xf32>
    %46 = arith.mulf %41, %45 : vector<8x48xf32>
    %47 = vector.extract_strided_slice %5 {offsets = [8, 0], sizes = [8, 48], strides = [1, 1]} : vector<32x48xf32> to vector<8x48xf32>
    %48 = arith.addf %17, %47 : vector<8x48xf32>
    %49 = vector.extract_strided_slice %11 {offsets = [8, 0], sizes = [8, 256], strides = [1, 1]} : vector<32x256xf32> to vector<8x256xf32>
    %50 = arith.truncf %46 : vector<8x48xf32> to vector<8x48xbf16>
    %cst_15 = arith.constant dense<0.000000e+00> : vector<8x256xf32>
    %51 = tpu.matmul %50, %12, %cst_15 {dimension_numbers = #tpu.dot_dimension_numbers<[1], [0], [0], [1], [0, 0, 1, 1], [], []>} : vector<8x48xbf16>, vector<48x256xbf16>, vector<8x256xf32> -> vector<8x256xf32>
    %52 = arith.addf %49, %51 : vector<8x256xf32>
    %53 = vector.extract_strided_slice %52 {offsets = [0, 0], sizes = [8, 48], strides = [1, 1]} : vector<8x256xf32> to vector<8x48xf32>
    %54 = arith.negf %53 : vector<8x48xf32>
    %55 = math.exp %54 : vector<8x48xf32>
    %cst_16 = arith.constant 1.000000e+00 : f32
    %56 = vector.broadcast %cst_16 : f32 to vector<8x48xf32>
    %57 = arith.addf %56, %55 : vector<8x48xf32>
    %58 = arith.divf %56, %57 : vector<8x48xf32>
    %59 = vector.extract_strided_slice %52 {offsets = [0, 64], sizes = [8, 48], strides = [1, 1]} : vector<8x256xf32> to vector<8x48xf32>
    %60 = arith.negf %59 : vector<8x48xf32>
    %61 = math.exp %60 : vector<8x48xf32>
    %cst_17 = arith.constant 1.000000e+00 : f32
    %62 = vector.broadcast %cst_17 : f32 to vector<8x48xf32>
    %63 = arith.addf %62, %61 : vector<8x48xf32>
    %64 = arith.divf %62, %63 : vector<8x48xf32>
    %65 = vector.extract_strided_slice %52 {offsets = [0, 128], sizes = [8, 48], strides = [1, 1]} : vector<8x256xf32> to vector<8x48xf32>
    %66 = math.tanh %65 : vector<8x48xf32>
    %67 = vector.extract_strided_slice %52 {offsets = [0, 192], sizes = [8, 48], strides = [1, 1]} : vector<8x256xf32> to vector<8x48xf32>
    %68 = arith.negf %67 : vector<8x48xf32>
    %69 = math.exp %68 : vector<8x48xf32>
    %cst_18 = arith.constant 1.000000e+00 : f32
    %70 = vector.broadcast %cst_18 : f32 to vector<8x48xf32>
    %71 = arith.addf %70, %69 : vector<8x48xf32>
    %72 = arith.divf %70, %71 : vector<8x48xf32>
    %73 = arith.mulf %64, %44 : vector<8x48xf32>
    %74 = arith.mulf %58, %66 : vector<8x48xf32>
    %75 = arith.addf %73, %74 : vector<8x48xf32>
    %76 = math.tanh %75 : vector<8x48xf32>
    %77 = arith.mulf %72, %76 : vector<8x48xf32>
    %78 = vector.extract_strided_slice %5 {offsets = [16, 0], sizes = [8, 48], strides = [1, 1]} : vector<32x48xf32> to vector<8x48xf32>
    %79 = arith.addf %48, %78 : vector<8x48xf32>
    %80 = vector.extract_strided_slice %11 {offsets = [16, 0], sizes = [8, 256], strides = [1, 1]} : vector<32x256xf32> to vector<8x256xf32>
    %81 = arith.truncf %77 : vector<8x48xf32> to vector<8x48xbf16>
    %cst_19 = arith.constant dense<0.000000e+00> : vector<8x256xf32>
    %82 = tpu.matmul %81, %12, %cst_19 {dimension_numbers = #tpu.dot_dimension_numbers<[1], [0], [0], [1], [0, 0, 1, 1], [], []>} : vector<8x48xbf16>, vector<48x256xbf16>, vector<8x256xf32> -> vector<8x256xf32>
    %83 = arith.addf %80, %82 : vector<8x256xf32>
    %84 = vector.extract_strided_slice %83 {offsets = [0, 0], sizes = [8, 48], strides = [1, 1]} : vector<8x256xf32> to vector<8x48xf32>
    %85 = arith.negf %84 : vector<8x48xf32>
    %86 = math.exp %85 : vector<8x48xf32>
    %cst_20 = arith.constant 1.000000e+00 : f32
    %87 = vector.broadcast %cst_20 : f32 to vector<8x48xf32>
    %88 = arith.addf %87, %86 : vector<8x48xf32>
    %89 = arith.divf %87, %88 : vector<8x48xf32>
    %90 = vector.extract_strided_slice %83 {offsets = [0, 64], sizes = [8, 48], strides = [1, 1]} : vector<8x256xf32> to vector<8x48xf32>
    %91 = arith.negf %90 : vector<8x48xf32>
    %92 = math.exp %91 : vector<8x48xf32>
    %cst_21 = arith.constant 1.000000e+00 : f32
    %93 = vector.broadcast %cst_21 : f32 to vector<8x48xf32>
    %94 = arith.addf %93, %92 : vector<8x48xf32>
    %95 = arith.divf %93, %94 : vector<8x48xf32>
    %96 = vector.extract_strided_slice %83 {offsets = [0, 128], sizes = [8, 48], strides = [1, 1]} : vector<8x256xf32> to vector<8x48xf32>
    %97 = math.tanh %96 : vector<8x48xf32>
    %98 = vector.extract_strided_slice %83 {offsets = [0, 192], sizes = [8, 48], strides = [1, 1]} : vector<8x256xf32> to vector<8x48xf32>
    %99 = arith.negf %98 : vector<8x48xf32>
    %100 = math.exp %99 : vector<8x48xf32>
    %cst_22 = arith.constant 1.000000e+00 : f32
    %101 = vector.broadcast %cst_22 : f32 to vector<8x48xf32>
    %102 = arith.addf %101, %100 : vector<8x48xf32>
    %103 = arith.divf %101, %102 : vector<8x48xf32>
    %104 = arith.mulf %95, %75 : vector<8x48xf32>
    %105 = arith.mulf %89, %97 : vector<8x48xf32>
    %106 = arith.addf %104, %105 : vector<8x48xf32>
    %107 = math.tanh %106 : vector<8x48xf32>
    %108 = arith.mulf %103, %107 : vector<8x48xf32>
    %109 = vector.extract_strided_slice %5 {offsets = [24, 0], sizes = [8, 48], strides = [1, 1]} : vector<32x48xf32> to vector<8x48xf32>
    %110 = arith.addf %79, %109 : vector<8x48xf32>
    %111 = vector.extract_strided_slice %11 {offsets = [24, 0], sizes = [8, 256], strides = [1, 1]} : vector<32x256xf32> to vector<8x256xf32>
    %112 = arith.truncf %108 : vector<8x48xf32> to vector<8x48xbf16>
    %cst_23 = arith.constant dense<0.000000e+00> : vector<8x256xf32>
    %113 = tpu.matmul %112, %12, %cst_23 {dimension_numbers = #tpu.dot_dimension_numbers<[1], [0], [0], [1], [0, 0, 1, 1], [], []>} : vector<8x48xbf16>, vector<48x256xbf16>, vector<8x256xf32> -> vector<8x256xf32>
    %114 = arith.addf %111, %113 : vector<8x256xf32>
    %115 = vector.extract_strided_slice %114 {offsets = [0, 0], sizes = [8, 48], strides = [1, 1]} : vector<8x256xf32> to vector<8x48xf32>
    %116 = arith.negf %115 : vector<8x48xf32>
    %117 = math.exp %116 : vector<8x48xf32>
    %cst_24 = arith.constant 1.000000e+00 : f32
    %118 = vector.broadcast %cst_24 : f32 to vector<8x48xf32>
    %119 = arith.addf %118, %117 : vector<8x48xf32>
    %120 = arith.divf %118, %119 : vector<8x48xf32>
    %121 = vector.extract_strided_slice %114 {offsets = [0, 64], sizes = [8, 48], strides = [1, 1]} : vector<8x256xf32> to vector<8x48xf32>
    %122 = arith.negf %121 : vector<8x48xf32>
    %123 = math.exp %122 : vector<8x48xf32>
    %cst_25 = arith.constant 1.000000e+00 : f32
    %124 = vector.broadcast %cst_25 : f32 to vector<8x48xf32>
    %125 = arith.addf %124, %123 : vector<8x48xf32>
    %126 = arith.divf %124, %125 : vector<8x48xf32>
    %127 = vector.extract_strided_slice %114 {offsets = [0, 128], sizes = [8, 48], strides = [1, 1]} : vector<8x256xf32> to vector<8x48xf32>
    %128 = math.tanh %127 : vector<8x48xf32>
    %129 = vector.extract_strided_slice %114 {offsets = [0, 192], sizes = [8, 48], strides = [1, 1]} : vector<8x256xf32> to vector<8x48xf32>
    %130 = arith.negf %129 : vector<8x48xf32>
    %131 = math.exp %130 : vector<8x48xf32>
    %cst_26 = arith.constant 1.000000e+00 : f32
    %132 = vector.broadcast %cst_26 : f32 to vector<8x48xf32>
    %133 = arith.addf %132, %131 : vector<8x48xf32>
    %134 = arith.divf %132, %133 : vector<8x48xf32>
    %135 = arith.mulf %126, %106 : vector<8x48xf32>
    %136 = arith.mulf %120, %128 : vector<8x48xf32>
    %137 = arith.addf %135, %136 : vector<8x48xf32>
    %138 = math.tanh %137 : vector<8x48xf32>
    %139 = arith.mulf %134, %138 : vector<8x48xf32>
    %cst_27 = arith.constant 2.500000e-01 : f32
    %140 = vector.broadcast %cst_27 : f32 to vector<8x48xf32>
    %141 = arith.mulf %110, %140 : vector<8x48xf32>
    %142 = arith.addf %139, %141 : vector<8x48xf32>
    %cst_28 = arith.constant dense<0.000000e+00> : vector<48xf32>
    %143 = vector.multi_reduction <add>, %142, %cst_28 [0] : vector<8x48xf32> to vector<48xf32>
    %144 = vector.shape_cast %143 : vector<48xf32> to vector<1x48xf32>
    %cst_29 = arith.constant 8.000000e+00 : f32
    %145 = vector.broadcast %cst_29 : f32 to vector<1x48xf32>
    %146 = arith.divf %144, %145 : vector<1x48xf32>
    %147 = vector.broadcast %146 : vector<1x48xf32> to vector<8x48xf32>
    %148 = arith.subf %142, %147 : vector<8x48xf32>
    %149 = arith.mulf %148, %148 : vector<8x48xf32>
    %cst_30 = arith.constant dense<0.000000e+00> : vector<48xf32>
    %150 = vector.multi_reduction <add>, %149, %cst_30 [0] : vector<8x48xf32> to vector<48xf32>
    %151 = vector.shape_cast %150 : vector<48xf32> to vector<1x48xf32>
    %cst_31 = arith.constant 8.000000e+00 : f32
    %152 = vector.broadcast %cst_31 : f32 to vector<1x48xf32>
    %153 = arith.divf %151, %152 : vector<1x48xf32>
    %154 = vector.broadcast %146 : vector<1x48xf32> to vector<8x48xf32>
    %155 = arith.subf %142, %154 : vector<8x48xf32>
    %cst_32 = arith.constant 9.99999974E-6 : f32
    %156 = vector.broadcast %cst_32 : f32 to vector<1x48xf32>
    %157 = arith.addf %153, %156 : vector<1x48xf32>
    %158 = math.rsqrt %157 : vector<1x48xf32>
    %159 = vector.broadcast %158 : vector<1x48xf32> to vector<8x48xf32>
    %160 = arith.mulf %155, %159 : vector<8x48xf32>
    %c0_33 = arith.constant 0 : index
    %c0_34 = arith.constant 0 : index
    %161 = vector.load %arg4[%c0_33, %c0_34] : memref<1x48xf32, #tpu.memory_space<vmem>>, vector<1x48xf32>
    %162 = vector.broadcast %161 : vector<1x48xf32> to vector<8x48xf32>
    %163 = arith.mulf %160, %162 : vector<8x48xf32>
    %c0_35 = arith.constant 0 : index
    %c0_36 = arith.constant 0 : index
    %164 = vector.load %arg5[%c0_35, %c0_36] : memref<1x48xf32, #tpu.memory_space<vmem>>, vector<1x48xf32>
    %165 = vector.broadcast %164 : vector<1x48xf32> to vector<8x48xf32>
    %166 = arith.addf %163, %165 : vector<8x48xf32>
    %167 = arith.truncf %166 : vector<8x48xf32> to vector<8x48xbf16>
    %c0_37 = arith.constant 0 : index
    %c0_38 = arith.constant 0 : index
    %168 = vector.load %arg6[%c0_37, %c0_38] : memref<48x49xbf16, #tpu.memory_space<vmem>>, vector<48x49xbf16>
    %cst_39 = arith.constant dense<0.000000e+00> : vector<8x49xf32>
    %169 = tpu.matmul %167, %168, %cst_39 {dimension_numbers = #tpu.dot_dimension_numbers<[1], [0], [0], [1], [0, 0, 1, 1], [], []>} : vector<8x48xbf16>, vector<48x49xbf16>, vector<8x49xf32> -> vector<8x49xf32>
    %c0_40 = arith.constant 0 : index
    %c0_41 = arith.constant 0 : index
    %170 = vector.load %arg7[%c0_40, %c0_41] : memref<1x49xf32, #tpu.memory_space<vmem>>, vector<1x49xf32>
    %171 = vector.broadcast %170 : vector<1x49xf32> to vector<8x49xf32>
    %172 = arith.addf %169, %171 : vector<8x49xf32>
    %173 = vector.extract_strided_slice %172 {offsets = [0, 48], sizes = [8, 1], strides = [1, 1]} : vector<8x49xf32> to vector<8x1xf32>
    %c0_42 = arith.constant 0 : index
    %c0_43 = arith.constant 0 : index
    %174 = vector.load %arg8[%c0_42, %c0_43] : memref<8x1xf32, #tpu.memory_space<vmem>>, vector<8x1xf32>
    tpu.vector_store %arg8[%c0_42, %c0_43], %173 {strides = array<i32>} : memref<8x1xf32, #tpu.memory_space<vmem>>, vector<8x1xf32>,
    %175 = vector.extract_strided_slice %172 {offsets = [0, 0], sizes = [8, 48], strides = [1, 1]} : vector<8x49xf32> to vector<8x48xf32>
    %176 = arith.truncf %175 : vector<8x48xf32> to vector<8x48xbf16>
    %177 = tpu.transpose %166, [1, 0] : vector<8x48xf32> -> vector<48x8xf32>
    %178 = arith.truncf %177 : vector<48x8xf32> to vector<48x8xbf16>
    %cst_44 = arith.constant dense<0.000000e+00> : vector<8x8xf32>
    %179 = tpu.matmul %176, %178, %cst_44 {dimension_numbers = #tpu.dot_dimension_numbers<[1], [0], [0], [1], [0, 0, 1, 1], [], []>} : vector<8x48xbf16>, vector<48x8xbf16>, vector<8x8xf32> -> vector<8x8xf32>
    %c0_45 = arith.constant 0 : index
    %c0_46 = arith.constant 0 : index
    %180 = vector.load %arg9[%c0_45, %c0_46] : memref<8x8xf32, #tpu.memory_space<vmem>>, vector<8x8xf32>
    tpu.vector_store %arg9[%c0_45, %c0_46], %179 {strides = array<i32>} : memref<8x8xf32, #tpu.memory_space<vmem>>, vector<8x8xf32>,
    return
  }
}

</mosaic_0001>

<bundles_post_ra>
// kernel: geml_forward.1
= control target key start
LH: loop header
LB: loop body
LE: loop exit
PB: predicated region body
PF: predicated region fallthrough
CT: control target
= control target key end

     0   :  { %v911_v2 = vmov 0   ;;  %s1126_s0 = inlined_call_operand.vmem [shape: f32[32,48], index: 0, kind: input, shape index: {}]   ;;  %s1127_s1 = inlined_call_operand.vmem [shape: bf16[48,256], index: 1, kind: input, shape index: {}]   ;;  %s1128_s2 = inlined_call_operand.vmem [shape: bf16[48,256], index: 2, kind: input, shape index: {}]   ;;  %s1129_s3 = inlined_call_operand.vmem [shape: f32[1,256], index: 3, kind: input, shape index: {}]   ;;  %s1130_s4 = inlined_call_operand.vmem [shape: f32[1,48], index: 4, kind: input, shape index: {}]   ;;  %s1131_s5 = inlined_call_operand.vmem [shape: f32[1,48], index: 5, kind: input, shape index: {}]   ;;  %s1132_s6 = inlined_call_operand.vmem [shape: bf16[48,49], index: 6, kind: input, shape index: {}]   ;;  %s1133_s7 = inlined_call_operand.vmem [shape: f32[1,49], index: 7, kind: input, shape index: {}]   ;;  %s1134_s8 = inlined_call_operand.vmem [shape: f32[8,1], index: 8, kind: output, shape index: {0}]   ;;  %s1135_s9 = inlined_call_operand.hbm [shape: f32[8,8], index: 9, kind: output, shape index: {1}]  }
   0x1   :  { %v802_v0 = vld [vmem:[%s1128_s2 + $0x24] ss:$8 sps:$4 sm:$0xff]   ;;  %v973_v1 = vld [vmem:[%s1128_s2 + $0x20] ss:$8 sps:$4 sm:$0xff]   ;;  %243 = vmatprep.mubr.bf16.mxu1 %v911_v2  ;;  %150 = vmatprep.mubr.bf16.mxu0 %v911_v2  ;;  %v984_v4 = vld [vmem:[%s1128_s2 + $0x14] ss:$8 sps:$4 sm:$0xff]  }
   0x2   :  { %221 = vmatprep.subr.bf16.mxu1 %v802_v0  ;;  %v805_v3 = vld [vmem:[%s1127_s1 + $0x24] ss:$8 sps:$4 sm:$0xff]   ;;  %v809_v5 = vld [vmem:[%s1127_s1 + $0x20] ss:$8 sps:$4 sm:$0xff]   ;;  %v992_v6 = vld [vmem:[%s1128_s2 + $0x10] ss:$8 sps:$4 sm:$0xff]  }
   0x3   :  { %222 = vmatpush1.bf16.msra.mxu1 %v973_v1  ;;  %128 = vmatprep.subr.bf16.mxu0 %v805_v3  ;;  %v811_v7 = vld [vmem:[%s1127_s1 + $0x14] ss:$8 sps:$4 sm:$0xff]   ;;  %v1001_v8 = vld [vmem:[%s1128_s2 + $0x4] ss:$8 sps:$4 sm:$0xff]   ;;  %v815_v9 = vld [vmem:[%s1127_s1 + $0x10] ss:$8 sps:$4 sm:$0xff]  }
   0x4   :  { %223 = vmatprep.subr.bf16.mxu1 %v984_v4  ;;  %129 = vmatpush1.bf16.msra.mxu0 %v809_v5  ;;  %v1009_v10 = vld [vmem:[%s1128_s2] ss:$8 sps:$4 sm:$0xff]   ;;  %v817_v11 = vld [vmem:[%s1127_s1 + $0x4] ss:$8 sps:$4 sm:$0xff]  }
   0x5   :  { %130 = vmatprep.subr.bf16.mxu0 %v811_v7  ;;  %v819_v12 = vld [vmem:[%s1127_s1] ss:$8 sps:$4 sm:$0xff]  }
   0x6   :  { %v33_v13 = vld [vmem:[%s1126_s0] sm:$0xff]  ;;  %v34_v14 = vld [vmem:[%s1126_s0 + $0x8] sm:$0xff] }
   0x7   :  { %224 = vmatpush1.bf16.msra.mxu1 %v992_v6  ;;  %v731_v15 = vmul.f32 -1.442695, %v33_v13  ;;  %v732_v16 = vmul.f32 -1.442695, %v34_v14 }
   0x8   :  { %225 = vmatprep.subr.bf16.mxu1 %v1001_v8  ;;  %131 = vmatpush1.bf16.msra.mxu0 %v815_v9 }
   0x9   :  { %132 = vmatprep.subr.bf16.mxu0 %v817_v11  ;;  %823 = vpow2.f32 %v731_v15 }
   0xb   :  { %226 = vmatpush1.bf16.msra.mxu1 %v1009_v10 }
   0xc   :  { %15 = vsyncpa [#allocation3], 0  ;;  %825 = vpow2.f32 %v732_v16  ;;  %294 = vmatprep.subr.bf16.mxu1 %v802_v0  ;;  %133 = vmatpush1.bf16.msra.mxu0 %v819_v12  ;;  %vm111_vm0 = vcmask 392192   ;;  %v71_v28 = vlaneseq  ;;  %v69_v31 = vld [vmem:[%s1129_s3] sm:$0x3]  ;;  %s912_s3 = smov 64  }
   0xd   :  { %367 = vmatprep.subr.bf16.mxu0 %v802_v0  ;;  %v35_v11 = vld [vmem:[%s1126_s0 + $0x10] sm:$0xff]  ;;  %v36_v12 = vld [vmem:[%s1126_s0 + $0x18] sm:$0xff]  ;;  %vm501_vm1 = vcmask 916992   ;;  %vm914_vm2 = vmmov 0   ;;  %s915_s28 = smov 80   ;;  %vm626_vm3 = vcmask 7168  }
   0xe   :  { %244 = vmatmul.mubr.bf16.vlgmr.msra.gmra.mxu1 %v911_v2  ;;  %v72_v29 = vshrl.u32 %v71_v28, 7  ;;  %v733_v13 = vmul.f32 -1.442695, %v35_v11  ;;  %v734_v14 = vmul.f32 -1.442695, %v36_v12  ;;  %s916_s10 = smov [#allocation2]  }
   0xf   :  { %295 = vmatpush1.bf16.msra.mxu1 %v973_v1  ;;  %316 = vmatprep.mubr.bf16.mxu1 %v911_v2  ;;  %s721_s11 = sshll.u32 %s916_s10, 4  ;;  %vm711_vm4 = vcmask 64512   ;;  %s722_s11 = int_to_ptr.vmem [resolvable:$true] %s721_s11 }
  0x10   :  { %296 = vmatprep.subr.bf16.mxu1 %v984_v4  ;;  %v73_v30 = vsub.s32 0, %v72_v29  ;;  %v77_v37 = vsub.s32 1, %v72_v29  ;;  %p894_p1 = scmp.lt.s32.totalorder %s722_s11, %s722_s11 }
  0x12   :  { %v1049_v32 = vrot.slane %v69_v31, %v73_v30  ;;  %v1052_v38 = vrot.slane %v69_v31, %v77_v37 }
  0x13   :  { %297 = vmatpush1.bf16.msra.mxu1 %v992_v6 }
  0x14   :  { %298 = vmatprep.subr.bf16.mxu1 %v1001_v8 }
  0x16   :  { %v824_v17 = vpop.eup %823 }
  0x17   :  { %299 = vmatpush1.bf16.msra.mxu1 %v1009_v10  ;;  %v49_v19 = vadd.f32 1.0, %v824_v17 }
  0x18   :  { %440 = vmatprep.subr.bf16.mxu1 %v802_v0 }
  0x19   :  { %v826_v18 = vpop.eup %825  ;;  %827 = vrcp.f32 %v49_v19 }
  0x1a   :  { %v50_v20 = vadd.f32 1.0, %v826_v18 }
  0x1c   :  { %829 = vrcp.f32 %v50_v20 }
  0x26   :  { %v1033_v21 = vpop.eup %827 }
  0x29   :  { %v1035_v22 = vpop.eup %829 }
  0x2a   :  { %v61_v23 = vpack.c.bf16 %v1035_v22, %v1033_v21 }
  0x2c   :  { %741 = vmatmul.mubr.msk.bf16.vlgmr.msra.gmra.mxu0 %vm111_vm0, %v61_v23 }
  0x2d   :  { %368 = vmatpush1.bf16.msra.mxu0 %v973_v1  ;;  %160 = vmatprep.mubr.bf16.mxu0 %v911_v2 }
  0x2e   :  { %369 = vmatprep.subr.bf16.mxu0 %v984_v4 }
  0x31   :  { %370 = vmatpush1.bf16.msra.mxu0 %v992_v6 }
  0x32   :  { %371 = vmatprep.subr.bf16.mxu0 %v1001_v8 }
  0x35   :  { %372 = vmatpush1.bf16.msra.mxu0 %v1009_v10 }
  0xce   :  { %v245_v24 = vpop.f32.mrf.mxu1 }
  0xd0   :  { %v247_v25 = vpop.f32.mrf.mxu1 }
  0xd2   :  { %v249_v26 = vpop.f32.mrf.mxu1 }
  0xd4   :  { %v250_v27 = vpop.f32.mrf.mxu1 }
  0xec   :  { %v152_v33 = vpop.f32.mrf.mxu0 }
  0xed   :  { %v153_v34 = vadd.f32 %v152_v33, %v1049_v32 }
  0xee   :  { %v154_v39 = vpop.f32.mrf.mxu0 }
  0xef   :  { %v252_v35 = vadd.f32 %v245_v24, %v153_v34  ;;  %v155_v40 = vadd.f32 %v154_v39, %v1052_v38 }
  0xf0   :  { %v156_v58 = vpop.f32.mrf.mxu0 }
  0xf1   :  { %v749_v36 = vmul.f32 -1.442695, %v252_v35  ;;  %v253_v41 = vadd.f32 %v247_v25, %v155_v40  ;;  %v157_v59 = vadd.f32 %v156_v58, %v1049_v32 }
  0xf2   :  { %v158_v3 = vpop.f32.mrf.mxu0 }
  0xf3   :  { %831 = vpow2.f32 %v749_v36  ;;  %v750_v47 = vmul.f32 -1.442695, %v253_v41  ;;  %v159_v5 = vadd.f32 %v158_v3, %v1052_v38 }
  0xf4   :  { %833 = vtanh.f32 %v253_v41 }
 0x100   :  { %v832_v42 = vpop.eup %831 }
 0x101   :  { %v257_v43 = vadd.f32 1.0, %v832_v42  ;;  %v834_v44 = vpop.eup %833 }
 0x103   :  { %835 = vrcp.f32 %v257_v43 }
 0x104   :  { %837 = vpow2.f32 %v750_v47 }
 0x110   :  { %v836_v45 = vpop.eup %835 }
 0x111   :  { %v268_v46 = vmul.f32 %v836_v45, %v834_v44  ;;  %v838_v48 = vpop.eup %837  ;;  %v267_v50 = vmul.f32 0.0, %v836_v45 }
 0x112   :  { %v264_v49 = vadd.f32 1.0, %v838_v48 }
 0x113   :  { %270 = vrot.lane.b32.xlu0 %v268_v46, %s912_s3 }
 0x114   :  { %839 = vrcp.f32 %v264_v49 }
 0x121   :  { %v840_v53 = vpop.eup %839 }
 0x185   :  { %v271_v51 = vpop.permute.xlu0 %270 }
 0x186   :  { %v273_v52 = vadd.f32 %v271_v51, %v267_v50 }
 0x188   :  { %841 = vtanh.f32 %v273_v52 }
 0x195   :  { %v842_v54 = vpop.eup %841 }
 0x196   :  { %v275_v55 = vmul.f32 %v842_v54, %v840_v53 }
 0x198   :  { %v277_v56 = vpack.c.bf16 %v275_v55, %v275_v55 }
 0x19a   :  { %279 = vrot.lane.b32.xlu0 %v277_v56, %s912_s3 }
 0x20c   :  { %v280_v57 = vpop.permute.xlu0 %279 }
 0x20d   :  { %751 = vmatmul.mubr.msk.bf16.vlgmr.msra.gmra.mxu1 %vm111_vm0, %v280_v57 }
 0x20e   :  { %441 = vmatpush1.bf16.msra.mxu1 %v973_v1  ;;  %462 = vmatprep.mubr.bf16.mxu1 %v911_v2 }
 0x20f   :  { %442 = vmatprep.subr.bf16.mxu1 %v984_v4 }
 0x212   :  { %443 = vmatpush1.bf16.msra.mxu1 %v992_v6 }
 0x213   :  { %444 = vmatprep.subr.bf16.mxu1 %v1001_v8 }
 0x216   :  { %445 = vmatpush1.bf16.msra.mxu1 %v1009_v10 }
 0x2cd   :  { %v318_v60 = vpop.f32.mrf.mxu1 }
 0x2ce   :  { %v325_v61 = vadd.f32 %v318_v60, %v157_v59 }
 0x2cf   :  { %v320_v62 = vpop.f32.mrf.mxu1 }
 0x2d0   :  { %v752_v63 = vmul.f32 -1.442695, %v325_v61  ;;  %v326_v4 = vadd.f32 %v320_v62, %v159_v5 }
 0x2d1   :  { %v322_v0 = vpop.f32.mrf.mxu1 }
 0x2d2   :  { %843 = vpow2.f32 %v752_v63  ;;  %v753_v24 = vmul.f32 -1.442695, %v326_v4 }
 0x2d3   :  { %v323_v1 = vpop.f32.mrf.mxu1  ;;  %845 = vtanh.f32 %v326_v4 }
 0x2d4   :  { %v276_v1 = vadd.f32 %v1035_v22, %v1033_v21 }
 0x2df   :  { %v844_v7 = vpop.eup %843 }
 0x2e0   :  { %v330_v6 = vadd.f32 1.0, %v844_v7  ;;  %v846_v8 = vpop.eup %845  ;;  %v761_v7 = vld [vmem:[%s1131_s5] ss:$0 sm:$0xff] }
 0x2e2   :  { %847 = vrcp.f32 %v330_v6 }
 0x2e3   :  { %849 = vpow2.f32 %v733_v13 }
 0x2e4   :  { %851 = vpow2.f32 %v734_v14 }
 0x2ef   :  { %v848_v9 = vpop.eup %847 }
 0x2f0   :  { %v341_v10 = vmul.f32 %v848_v9, %v846_v8  ;;  %v850_v15 = vpop.eup %849  ;;  %v340_v27 = vmul.f32 %v848_v9, %v273_v52 }
 0x2f1   :  { %v852_v16 = vpop.eup %851  ;;  %v51_v17 = vadd.f32 1.0, %v850_v15 }
 0x2f2   :  { %343 = vrot.lane.b32.xlu1 %v341_v10, %s912_s3  ;;  %v52_v18 = vadd.f32 1.0, %v852_v16 }
 0x2f3   :  { %853 = vrcp.f32 %v51_v17 }
 0x2f4   :  { %855 = vrcp.f32 %v52_v18 }
 0x2f5   :  { %857 = vpow2.f32 %v753_v24 }
 0x300   :  { %v854_v19 = vpop.eup %853 }
 0x301   :  { %v856_v20 = vpop.eup %855  ;;  %v349_v3 = vadd.f32 %v854_v19, %v276_v1 }
 0x302   :  { %v62_v23 = vpack.c.bf16 %v856_v20, %v854_v19  ;;  %v858_v25 = vpop.eup %857  ;;  %v913_v19 = vmov 0.0  }
 0x303   :  { %v337_v26 = vadd.f32 1.0, %v858_v25  ;;  %v422_v5 = vadd.f32 %v856_v20, %v349_v3  ;;  %776 = vmatprep.subr.bf16.mxu0 %v913_v19  ;;  %786 = vmatprep.subr.bf16.mxu1 %v913_v19  ;;  %v821_v20 = vld [vmem:[%s1132_s6 + $0x8] sm:$0xff]  }
 0x304   :  { %742 = vmatmul.mubr.msk.bf16.gmra.mxu0 %vm111_vm0, %v62_v23  ;;  %v822_v23 = vld [vmem:[%s1132_s6] sm:$0xff]  }
 0x305   :  { %389 = vmatprep.mubr.bf16.mxu0 %v911_v2  ;;  %859 = vrcp.f32 %v337_v26  ;;  %v495_v4 = vmul.f32 0.25, %v422_v5 }
 0x312   :  { %v860_v30 = vpop.eup %859 }
 0x364   :  { %v344_v28 = vpop.permute.xlu1 %343 }
 0x365   :  { %v346_v29 = vadd.f32 %v344_v28, %v340_v27 }
 0x367   :  { %861 = vtanh.f32 %v346_v29 }
 0x374   :  { %v862_v31 = vpop.eup %861 }
 0x375   :  { %v348_v33 = vmul.f32 %v862_v31, %v860_v30 }
 0x377   :  { %v350_v34 = vpack.c.bf16 %v348_v33, %v348_v33 }
 0x379   :  { %352 = vrot.lane.b32.xlu1 %v350_v34, %s912_s3 }
 0x3c4   :  { %v162_v36 = vpop.f32.mrf.mxu0 }
 0x3c5   :  { %v163_v40 = vadd.f32 %v162_v36, %v1049_v32 }
 0x3c6   :  { %v164_v2 = vpop.f32.mrf.mxu0 }
 0x3c7   :  { %v165_v47 = vadd.f32 %v164_v2, %v1052_v38 }
 0x3c8   :  { %v166_v37 = vpop.f32.mrf.mxu0 }
 0x3c9   :  { %v167_v6 = vadd.f32 %v166_v37, %v1049_v32  ;;  %v760_v32 = vld [vmem:[%s1130_s4] ss:$0 sm:$0xff] }
 0x3ca   :  { %v168_v39 = vpop.f32.mrf.mxu0 }
 0x3cb   :  { %v169_v22 = vadd.f32 %v168_v39, %v1052_v38  ;;  %v820_v38 = vld [vmem:[%s1132_s6 + $0x10] sm:$0xff]  }
 0x3eb   :  { %v353_v35 = vpop.permute.xlu1 %352 }
 0x3ec   :  { %754 = vmatmul.mubr.msk.bf16.vlgmr.msra.gmra.mxu0 %vm111_vm0, %v353_v35 }
 0x3ed   :  { %777 = vmatpush3.bf16.msra.mxu0 %v820_v38  ;;  %782 = vmatprep.mubr.msk.bf16.mxu0 %vm914_vm2, %v913_v19 }
 0x3ee   :  { %778 = vmatprep.subr.bf16.mxu0 %v913_v19 }
 0x3f1   :  { %779 = vmatpush3.bf16.msra.mxu0 %v821_v20 }
 0x3f2   :  { %780 = vmatprep.subr.bf16.mxu0 %v913_v19 }
 0x3f5   :  { %781 = vmatpush3.bf16.msra.mxu0 %v822_v23 }
 0x4ac   :  { %v391_v41 = vpop.f32.mrf.mxu0 }
 0x4ad   :  { %v398_v42 = vadd.f32 %v391_v41, %v163_v40 }
 0x4ae   :  { %v393_v43 = vpop.f32.mrf.mxu0 }
 0x4af   :  { %v755_v44 = vmul.f32 -1.442695, %v398_v42  ;;  %v399_v48 = vadd.f32 %v393_v43, %v165_v47 }
 0x4b0   :  { %v395_v45 = vpop.f32.mrf.mxu0 }
 0x4b1   :  { %863 = vpow2.f32 %v755_v44  ;;  %v756_v54 = vmul.f32 -1.442695, %v399_v48 }
 0x4b2   :  { %v396_v46 = vpop.f32.mrf.mxu0  ;;  %865 = vtanh.f32 %v399_v48 }
 0x4be   :  { %v864_v49 = vpop.eup %863 }
 0x4bf   :  { %v403_v50 = vadd.f32 1.0, %v864_v49  ;;  %v866_v51 = vpop.eup %865 }
 0x4c1   :  { %867 = vrcp.f32 %v403_v50 }
 0x4c2   :  { %869 = vpow2.f32 %v756_v54 }
 0x4ce   :  { %v868_v52 = vpop.eup %867 }
 0x4cf   :  { %v414_v53 = vmul.f32 %v868_v52, %v866_v51  ;;  %v870_v55 = vpop.eup %869  ;;  %v413_v57 = vmul.f32 %v868_v52, %v346_v29 }
 0x4d0   :  { %v410_v56 = vadd.f32 1.0, %v870_v55 }
 0x4d1   :  { %416 = vrot.lane.b32.xlu0 %v414_v53, %s912_s3 }
 0x4d2   :  { %871 = vrcp.f32 %v410_v56 }
 0x4df   :  { %v872_v60 = vpop.eup %871 }
 0x543   :  { %v417_v58 = vpop.permute.xlu0 %416 }
 0x544   :  { %v419_v59 = vadd.f32 %v417_v58, %v413_v57 }
 0x546   :  { %873 = vtanh.f32 %v419_v59 }
 0x553   :  { %v874_v61 = vpop.eup %873 }
 0x554   :  { %v421_v62 = vmul.f32 %v874_v61, %v872_v60 }
 0x556   :  { %v423_v63 = vpack.c.bf16 %v421_v62, %v421_v62 }
 0x558   :  { %425 = vrot.lane.b32.xlu1 %v423_v63, %s912_s3 }
 0x55c   :  { %497 = vrot.lane.b32.xlu1 %v495_v4, %s912_s3 }
 0x560   :  { %540 = vrot.lane.b32.xlu1 %v761_v7, %s912_s3 }
 0x5ca   :  { %v426_v0 = vpop.permute.xlu1 %425 }
 0x5cb   :  { %757 = vmatmul.mubr.msk.bf16.vlgmr.msra.gmra.mxu1 %vm111_vm0, %v426_v0 }
 0x5cc   :  { %792 = vmatprep.mubr.msk.bf16.mxu1 %vm914_vm2, %v913_v19 }
 0x5ce   :  { %v498_v33 = vpop.permute.xlu1 %497 }
 0x5d2   :  { %v541_v58 = vpop.permute.xlu1 %540 }
 0x68b   :  { %v464_v8 = vpop.f32.mrf.mxu1 }
 0x68c   :  { %v471_v9 = vadd.f32 %v464_v8, %v167_v6 }
 0x68d   :  { %v466_v10 = vpop.f32.mrf.mxu1 }
 0x68e   :  { %v758_v11 = vmul.f32 -1.442695, %v471_v9  ;;  %v472_v13 = vadd.f32 %v466_v10, %v169_v22  ;;  %v762_v10 = vld [vmem:[%s1133_s7] ss:$0 sm:$0xff]  ;;  %s889_s7 = scalar_lea.vmem %s722_s11, 128 }
 0x68f   :  { %v468_v12 = vpop.f32.mrf.mxu1  ;;  %p890_p0 = scmp.ne.s32.totalorder %s722_s11, %s889_s7  ;;  %p895_p2 = scmp.lt.s32.totalorder %s889_s7, %s889_s7 }
 0x690   :  { %875 = vpow2.f32 %v758_v11  ;;  %v759_v24 = vmul.f32 -1.442695, %v472_v13 }
 0x691   :  { %v469_v21 = vpop.f32.mrf.mxu1  ;;  %877 = vtanh.f32 %v472_v13  ;;  %p896_p3 = por %p895_p2, %p894_p1 }
 0x693   :  { %p897_p4 = pnand %p896_p3, %p890_p0 }
 0x69d   :  { %v876_v14 = vpop.eup %875 }
 0x69e   :  { %v476_v15 = vadd.f32 1.0, %v876_v14  ;;  %v878_v16 = vpop.eup %877 }
 0x6a0   :  { %879 = vrcp.f32 %v476_v15 }
 0x6a1   :  { %881 = vpow2.f32 %v759_v24 }
 0x6ad   :  { %v880_v17 = vpop.eup %879 }
 0x6ae   :  { %v487_v18 = vmul.f32 %v880_v17, %v878_v16  ;;  %v882_v25 = vpop.eup %881  ;;  %v486_v27 = vmul.f32 %v880_v17, %v419_v59 }
 0x6af   :  { %v483_v26 = vadd.f32 1.0, %v882_v25 }
 0x6b0   :  { %489 = vrot.lane.b32.xlu0 %v487_v18, %s912_s3 }
 0x6b1   :  { %883 = vrcp.f32 %v483_v26 }
 0x6b4   :  { %530 = vrot.lane.b32.xlu0 %v760_v32, %s912_s3 }
 0x6be   :  { %v884_v30 = vpop.eup %883 }
 0x722   :  { %v490_v28 = vpop.permute.xlu0 %489 }
 0x723   :  { %v492_v29 = vadd.f32 %v490_v28, %v486_v27 }
 0x725   :  { %885 = vtanh.f32 %v492_v29 }
 0x726   :  { %v531_v56 = vpop.permute.xlu0 %530 }
 0x732   :  { %v886_v31 = vpop.eup %885 }
 0x733   :  { %v494_v34 = vmul.f32 %v886_v31, %v884_v30 }
 0x735   :  { %v500_v35 = vadd.f32 %v498_v33, %v494_v34 }
 0x737   :  { %v502_v36 = vsel %vm501_vm1, %v500_v35, 0.0 }
 0x738   :  { %v503_v2 = vrot.slane %v502_v36, 4 }
 0x73a   :  { %v504_v37 = vadd.f32 %v503_v2, %v502_v36 }
 0x73c   :  { %v505_v39 = vrot.slane %v504_v37, 2 }
 0x73e   :  { %v506_v40 = vadd.f32 %v505_v39, %v504_v37 }
 0x740   :  { %v507_v41 = vrot.slane %v506_v40, 1 }
 0x742   :  { %v508_v42 = vadd.f32 %v507_v41, %v506_v40 }
 0x744   :  { %v510_v43 = vmul.f32 0.125, %v508_v42 }
 0x746   :  { %v511_v44 = vsub.f32 %v500_v35, %v510_v43 }
 0x748   :  { %v512_v45 = vmul.f32 %v511_v44, %v511_v44 }
 0x74a   :  { %v513_v46 = vsel %vm501_vm1, %v512_v45, 0.0 }
 0x74b   :  { %v514_v47 = vrot.slane %v513_v46, 4 }
 0x74d   :  { %v515_v48 = vadd.f32 %v514_v47, %v513_v46 }
 0x74f   :  { %v516_v49 = vrot.slane %v515_v48, 2 }
 0x751   :  { %v517_v50 = vadd.f32 %v516_v49, %v515_v48 }
 0x753   :  { %v518_v51 = vrot.slane %v517_v50, 1 }
 0x755   :  { %v519_v52 = vadd.f32 %v518_v51, %v517_v50 }
 0x757   :  { %v520_v53 = vmul.f32 0.125, %v519_v52 }
 0x759   :  { %v521_v54 = vadd.f32 1e-05, %v520_v53 }
 0x75b   :  { %887 = vrsqrt.f32 %v521_v54 }
 0x768   :  { %v888_v55 = vpop.eup %887 }
 0x769   :  { %v523_v57 = vmul.f32 %v888_v55, %v511_v44 }
 0x76b   :  { %v533_v59 = vmul.f32 %v531_v56, %v523_v57 }
 0x76d   :  { %v543_v60 = vadd.f32 %v541_v58, %v533_v59 }
 0x76f   :  { %v544_v61 = vpack.c.bf16 %v543_v60, %v543_v60  ;;  %630 = vrot.lane.b32.xlu1 %v543_v60, %s912_s3 }
 0x771   :  { %559 = vrot.lane.b32.xlu0 %v544_v61, %s912_s3 }
 0x7e1   :  { %v631_v62 = vpop.permute.xlu1 %630 }
 0x7e2   :  { %633 = vxpose.xlu0.b32.start.end [1/1] (short) (narrow) %v631_v62, 48 }
 0x7e3   :  { %v560_v63 = vpop.permute.xlu0 %559 }
 0x7e4   :  { %783 = vmatmul.mubr.msk.bf16.vlgmr.msra.gmra.mxu0 %vm111_vm0, %v560_v63 }
 0x85e   :  { %v649_v0 = vpop.trf.xlu0 }
 0x862   :  { %v650_v1 = vpop.trf.xlu0 }
 0x863   :  { %v665_v9 = vpack.c.bf16 %v650_v1, %v649_v0 }
 0x866   :  { %v651_v3 = vpop.trf.xlu0 }
 0x86a   :  { %v652_v5 = vpop.trf.xlu0 }
 0x86b   :  { %v666_v8 = vpack.c.bf16 %v652_v5, %v651_v3 }
 0x86e   :  { %v653_v4 = vpop.trf.xlu0 }
 0x872   :  { %v654_v7 = vpop.trf.xlu0 }
 0x873   :  { %v667_v6 = vpack.c.bf16 %v654_v7, %v653_v4 }
 0x875   :  { %787 = vmatpush3.bf16.msra.mxu1 %v667_v6 }
 0x876   :  { %788 = vmatprep.subr.bf16.mxu1 %v913_v19 }
 0x879   :  { %789 = vmatpush3.bf16.msra.mxu1 %v666_v8 }
 0x87a   :  { %790 = vmatprep.subr.bf16.mxu1 %v913_v19 }
 0x87d   :  { %791 = vmatpush3.bf16.msra.mxu1 %v665_v9 }
 0x8a4   :  { %v616_v11 = vpop.f32.mrf.mxu0 }
 0x8a5   :  { %v617_v12 = vadd.f32 %v762_v10, %v616_v11 }
 0x8a6   :  { %v784_v21 = vpop.f32.mrf.mxu0 }
 0x8a7   :  { %v628_v22 = vpack.c.bf16 %v617_v12, %v617_v12  ;;  %623 = vrot.lane.b32.xlu1 %v617_v12, %s915_s28 }
 0x8a8   :  { %v619_v13 = vpop.f32.mrf.mxu0 }
 0x8a9   :  { %793 = vmatmul.mubr.msk.bf16.vlgmr.msra.gmra.mxu1 %vm111_vm0, %v628_v22 }
 0x8aa   :  { %v785_v14 = vpop.f32.mrf.mxu0 }
 0x919   :  { %v624_v15 = vpop.permute.xlu1 %623 }
 0x91a   :  { %627 = vst.msk [vmem:[%s1134_s8] sm:$0xff] %vm626_vm3, %v624_v15 }
 0x969   :  { %v705_v16 = vpop.f32.mrf.mxu1 }
 0x96a   :  { %712 = vst.msk [vmem:[#allocation2] sm:$0xff] %vm711_vm4, %v705_v16 }
 0x96b   :  { %v794_v17 = vpop.f32.mrf.mxu1 }
 0x96c   :  { %900 = shalt.err (!%p897_p4)
}
 0x96d   :  { %724 = dma.vmem_to_hbm [thread:$0]  %s722_s11, 128, %s1135_s9, [#allocation3]   ;;  %v708_v18 = vpop.f32.mrf.mxu1 }
 0x96f   :  { %v795_v32 = vpop.f32.mrf.mxu1 }
 0x970   :  { %909 = dma.done.wait [#allocation3], 128  }
 0x971   :  { %910 = vsyncadd [#allocation3], 4294967168 }
 0x972   :  { %730 = vsyncpa [#allocation3], 1 }

</bundles_post_ra>
